<compile_context>
chip_gen: v7x
topology: tpu7x:2x2x1
jax: 0.10.0
libtpu: 0.0.40
codegen_flags: <defaults>
</compile_context>

<pallas_src>
import jax
import jax.numpy as jnp
from jax.experimental import pallas as pl
from jax.experimental.pallas import tpu as pltpu

BN_EPS = 1e-5
LEAKY_SLOPE = 0.01
PACK = 4  # pack 4 rows of 32 features into one 128-lane row


def feature_decoder_kernel(x_ref, s_ref, t_ref, w_ref, b_ref, o_ref):
    # x_ref: (tm, 128)     4-row-packed input tile
    # s_ref: (1, 128)      folded BN scale  (gamma * rsqrt(var + eps), tiled x4)
    # t_ref: (1, 128)      folded BN shift  (beta - mean * scale, tiled x4)
    # w_ref: (128, 4*D)    block-diagonal kron(I4, W.T)
    # b_ref: (1, 4*D)      bias tiled x4
    # o_ref: (tm, 4*D)     4-row-packed output tile
    y = x_ref[...] * s_ref[...] + t_ref[...]            # folded BatchNorm (FMA)
    y = jnp.maximum(y, LEAKY_SLOPE * y)                  # LeakyReLU (slope in (0,1))
    out = jnp.dot(y, w_ref[...], preferred_element_type=jnp.float32) + b_ref[...]
    o_ref[...] = out.astype(o_ref.dtype)


def feature_decoder(x, gamma, beta, weight, bias, *, block_rows=2048):
    """x: (N, 32); gamma/beta: (32,); weight: (input_dim, 32); bias: (input_dim,).

    block_rows is the row tile measured in *packed* rows (1 packed row == 4 input rows).
    """
    n, f = x.shape
    input_dim = weight.shape[0]
    x = x.astype(jnp.float32)

    # --- BatchNorm1d training-mode stats over the FULL batch, single HBM pass:
    # mean and E[x^2] together, biased var = E[x^2] - mean^2. Folded into per-feature
    # scale/shift so the tiled kernel body stays exact full-batch BN. ---
    m1 = jnp.mean(x, axis=0, keepdims=True)                        # (1, F)
    m2 = jnp.mean(x * x, axis=0, keepdims=True)                    # (1, F)
    var = jnp.maximum(m2 - m1 * m1, 0.0)                           # (1, F)
    s = gamma.reshape(1, f).astype(jnp.float32) * jax.lax.rsqrt(var + BN_EPS)
    t = beta.reshape(1, f).astype(jnp.float32) - m1 * s

    # --- Lane-dense repack: 4 rows x 32 features -> one 128-lane row (free reshape). ---
    n4 = ((n + PACK - 1) // PACK) * PACK
    if n4 != n:
        x = jnp.pad(x, ((0, n4 - n), (0, 0)))        # <= 3 garbage rows, sliced off below
    rows = n4 // PACK
    x_packed = x.reshape(rows, PACK * f)                           # (rows, 128)

    s_packed = jnp.tile(s, (1, PACK))                              # (1, 128)
    t_packed = jnp.tile(t, (1, PACK))                              # (1, 128)
    w_bd = jnp.kron(jnp.eye(PACK, dtype=jnp.float32),
                    weight.T.astype(jnp.float32))                  # (128, 4*D)
    b_packed = jnp.tile(bias.reshape(1, input_dim).astype(jnp.float32),
                        (1, PACK))                                 # (1, 4*D)
    out_w = PACK * input_dim

    # Row tile: full array if a single block suffices, else a multiple of 8 sublanes;
    # the ragged last block (if any) is handled by Pallas -- no full-array padding.
    if block_rows >= rows:
        tm = rows
    else:
        tm = max(8, (int(block_rows) // 8) * 8)
    grid = (pl.cdiv(rows, tm),)

    flops = 2 * rows * (PACK * f) * out_w
    bytes_accessed = 4 * (rows * (PACK * f + out_w)
                          + PACK * f * out_w + 2 * PACK * f + out_w)

    out = pl.pallas_call(
        feature_decoder_kernel,
        out_shape=jax.ShapeDtypeStruct((rows, out_w), jnp.float32),
        grid_spec=pltpu.PrefetchScalarGridSpec(
            num_scalar_prefetch=0,
            grid=grid,
            in_specs=[
                pl.BlockSpec((tm, PACK * f), lambda i: (i, 0)),
                pl.BlockSpec((1, PACK * f), lambda i: (0, 0)),
                pl.BlockSpec((1, PACK * f), lambda i: (0, 0)),
                pl.BlockSpec((PACK * f, out_w), lambda i: (0, 0)),
                pl.BlockSpec((1, out_w), lambda i: (0, 0)),
            ],
            out_specs=pl.BlockSpec((tm, out_w), lambda i: (i, 0)),
        ),
        compiler_params=pltpu.CompilerParams(
            dimension_semantics=("parallel",),     # shard row tiles across TCs on v7x
            vmem_limit_bytes=32 * 1024 * 1024,     # ~6 MB double-buffered at default tile
        ),
        cost_estimate=pl.CostEstimate(
            flops=int(flops), transcendentals=0,
            bytes_accessed=int(bytes_accessed)),
    )(x_packed, s_packed, t_packed, w_bd, b_packed)

    # Packed (rows, 4*D) -> (n4, D) is a free row-major reshape; drop pad rows.
    return out.reshape(n4, input_dim)[:n]


def reference(x, gamma, beta, weight, bias):
    """Pure-JAX reference mirroring the PyTorch forward (training-mode BN)."""
    mean = jnp.mean(x, axis=0, keepdims=True)
    var = jnp.mean((x - mean) ** 2, axis=0, keepdims=True)
    xh = (x - mean) / jnp.sqrt(var + BN_EPS)
    y = xh * gamma[None, :] + beta[None, :]
    y = jnp.where(y >= 0.0, y, LEAKY_SLOPE * y)
    return y @ weight.T + bias[None, :]


if __name__ == "__main__":
    key = jax.random.PRNGKey(0)
    k_x1, k_x2, k_x3, k_g, k_b, k_w, k_bias = jax.random.split(key, 7)

    F_DIM = 32       # BatchNorm1d(32) / Linear in_features
    INPUT_DIM = 64   # Linear out_features (the module's `input_dim`)

    # Deterministic parameter init (synthetic, not a checkpoint load).
    gamma = 1.0 + 0.1 * jax.random.normal(k_g, (F_DIM,), dtype=jnp.float32)
    beta = 0.1 * jax.random.normal(k_b, (F_DIM,), dtype=jnp.float32)
    bound = 1.0 / jnp.sqrt(F_DIM)
    weight = jax.random.uniform(k_w, (INPUT_DIM, F_DIM), minval=-bound, maxval=bound,
                                dtype=jnp.float32)
    bias = jax.random.uniform(k_bias, (INPUT_DIM,), minval=-bound, maxval=bound,
                              dtype=jnp.float32)

    # Case 1: tiny batch, single grid step (block == full packed array).
    N1 = 8
    x1 = jax.random.normal(k_x1, (N1, F_DIM), dtype=jnp.float32)
    out1 = jax.block_until_ready(feature_decoder(x1, gamma, beta, weight, bias))
    ref1 = reference(x1, gamma, beta, weight, bias)
    assert out1.shape == (N1, INPUT_DIM)
    assert jnp.allclose(out1, ref1, atol=1e-4, rtol=1e-4), "case 1 mismatch vs reference"

    # Case 2: N % 4 != 0 (small repack pad) + ragged last grid block (rows=13, tile=8).
    N2 = 50
    x2 = jax.random.normal(k_x2, (N2, F_DIM), dtype=jnp.float32)
    out2 = jax.block_until_ready(feature_decoder(x2, gamma, beta, weight, bias, block_rows=8))
    ref2 = reference(x2, gamma, beta, weight, bias)
    assert out2.shape == (N2, INPUT_DIM)
    assert jnp.allclose(out2, ref2, atol=1e-4, rtol=1e-4), "case 2 mismatch vs reference"

    # Case 3: evenly dividing multi-step grid (rows=24, tile=8).
    N3 = 96
    x3 = jax.random.normal(k_x3, (N3, F_DIM), dtype=jnp.float32)
    out3 = jax.block_until_ready(feature_decoder(x3, gamma, beta, weight, bias, block_rows=8))
    ref3 = reference(x3, gamma, beta, weight, bias)
    assert out3.shape == (N3, INPUT_DIM)
    assert jnp.allclose(out3, ref3, atol=1e-4, rtol=1e-4), "case 3 mismatch vs reference"

    print("KERNEL_OK")
</pallas_src>

<mosaic_0001>
module attributes {stable_mosaic.version = 11 : i64} {
  func.func @feature_decoder_kernel(%arg0: i32, %arg1: memref<2x128xf32, #tpu.memory_space<vmem>>, %arg2: memref<1x128xf32, #tpu.memory_space<vmem>>, %arg3: memref<1x128xf32, #tpu.memory_space<vmem>>, %arg4: memref<128x256xf32, #tpu.memory_space<vmem>>, %arg5: memref<1x256xf32, #tpu.memory_space<vmem>>, %arg6: memref<2x256xf32, #tpu.memory_space<vmem>>) attributes {dimension_semantics = [#tpu.dimension_semantics<parallel>], iteration_bounds = array<i64: 1>, scalar_prefetch = 0 : i64, scratch_operands = 0 : i64, tpu.core_type = #tpu.core_type<tc>, window_params = [{transform_indices = @transform_0, window_bounds = array<i64: 2, 128>}, {pipeline_mode = #tpu.pipeline_mode<synchronous>, transform_indices = @transform_1, window_bounds = array<i64: 1, 128>}, {pipeline_mode = #tpu.pipeline_mode<synchronous>, transform_indices = @transform_2, window_bounds = array<i64: 1, 128>}, {pipeline_mode = #tpu.pipeline_mode<synchronous>, transform_indices = @transform_3, window_bounds = array<i64: 128, 256>}, {pipeline_mode = #tpu.pipeline_mode<synchronous>, transform_indices = @transform_4, window_bounds = array<i64: 1, 256>}, {transform_indices = @transform_5, window_bounds = array<i64: 2, 256>}]} {
    %c0 = arith.constant 0 : index
    %c0_0 = arith.constant 0 : index
    %0 = vector.load %arg1[%c0, %c0_0] : memref<2x128xf32, #tpu.memory_space<vmem>>, vector<2x128xf32>
    %c0_1 = arith.constant 0 : index
    %c0_2 = arith.constant 0 : index
    %1 = vector.load %arg2[%c0_1, %c0_2] : memref<1x128xf32, #tpu.memory_space<vmem>>, vector<1x128xf32>
    %2 = vector.broadcast %1 : vector<1x128xf32> to vector<2x128xf32>
    %3 = arith.mulf %0, %2 : vector<2x128xf32>
    %c0_3 = arith.constant 0 : index
    %c0_4 = arith.constant 0 : index
    %4 = vector.load %arg3[%c0_3, %c0_4] : memref<1x128xf32, #tpu.memory_space<vmem>>, vector<1x128xf32>
    %5 = vector.broadcast %4 : vector<1x128xf32> to vector<2x128xf32>
    %6 = arith.addf %3, %5 : vector<2x128xf32>
    %cst = arith.constant 0.00999999977 : f32
    %7 = vector.broadcast %cst : f32 to vector<2x128xf32>
    %8 = arith.mulf %7, %6 : vector<2x128xf32>
    %9 = arith.maximumf %6, %8 : vector<2x128xf32>
    %c0_5 = arith.constant 0 : index
    %c0_6 = arith.constant 0 : index
    %10 = vector.load %arg4[%c0_5, %c0_6] : memref<128x256xf32, #tpu.memory_space<vmem>>, vector<128x256xf32>
    %cst_7 = arith.constant dense<0.000000e+00> : vector<2x256xf32>
    %11 = tpu.matmul %9, %10, %cst_7 {dimension_numbers = #tpu.dot_dimension_numbers<[1], [0], [0], [1], [0, 0, 1, 1], [], []>} : vector<2x128xf32>, vector<128x256xf32>, vector<2x256xf32> -> vector<2x256xf32>
    %c0_8 = arith.constant 0 : index
    %c0_9 = arith.constant 0 : index
    %12 = vector.load %arg5[%c0_8, %c0_9] : memref<1x256xf32, #tpu.memory_space<vmem>>, vector<1x256xf32>
    %13 = vector.broadcast %12 : vector<1x256xf32> to vector<2x256xf32>
    %14 = arith.addf %11, %13 : vector<2x256xf32>
    %c0_10 = arith.constant 0 : index
    %c0_11 = arith.constant 0 : index
    %15 = vector.load %arg6[%c0_10, %c0_11] : memref<2x256xf32, #tpu.memory_space<vmem>>, vector<2x256xf32>
    tpu.vector_store %arg6[%c0_10, %c0_11], %14 {strides = array<i32>} : memref<2x256xf32, #tpu.memory_space<vmem>>, vector<2x256xf32>,
    return
  }
  func.func @transform_0(%arg0: i32) -> (i32, i32) {
    %c0_i32 = arith.constant 0 : i32
    %c0_i32_0 = arith.constant 0 : i32
    return %arg0, %c0_i32 : i32, i32
  }
  func.func @transform_1(%arg0: i32) -> (i32, i32) {
    %c0_i32 = arith.constant 0 : i32
    %c0_i32_0 = arith.constant 0 : i32
    %c0_i32_1 = arith.constant 0 : i32
    return %c0_i32, %c0_i32_0 : i32, i32
  }
  func.func @transform_2(%arg0: i32) -> (i32, i32) {
    %c0_i32 = arith.constant 0 : i32
    %c0_i32_0 = arith.constant 0 : i32
    %c0_i32_1 = arith.constant 0 : i32
    return %c0_i32, %c0_i32_0 : i32, i32
  }
  func.func @transform_3(%arg0: i32) -> (i32, i32) {
    %c0_i32 = arith.constant 0 : i32
    %c0_i32_0 = arith.constant 0 : i32
    %c0_i32_1 = arith.constant 0 : i32
    return %c0_i32, %c0_i32_0 : i32, i32
  }
  func.func @transform_4(%arg0: i32) -> (i32, i32) {
    %c0_i32 = arith.constant 0 : i32
    %c0_i32_0 = arith.constant 0 : i32
    %c0_i32_1 = arith.constant 0 : i32
    return %c0_i32, %c0_i32_0 : i32, i32
  }
  func.func @transform_5(%arg0: i32) -> (i32, i32) {
    %c0_i32 = arith.constant 0 : i32
    %c0_i32_0 = arith.constant 0 : i32
    return %arg0, %c0_i32 : i32, i32
  }
}

</mosaic_0001>

<bundles_post_ra>
// kernel: tpu_custom_call.1
= control target key start
LH: loop header
LB: loop body
LE: loop exit
PB: predicated region body
PF: predicated region fallthrough
CT: control target
= control target key end

     0   :  { %10 = vsyncpa [#allocation3], 0  ;;  %s410_s0 = inlined_call_operand.hbm [shape: f32[2,128], index: 0, kind: input, shape index: {}]   ;;  %s411_s1 = inlined_call_operand.vmem [shape: f32[1,128], index: 1, kind: input, shape index: {}]   ;;  %s412_s2 = inlined_call_operand.vmem [shape: f32[1,128], index: 2, kind: input, shape index: {}]   ;;  %s413_s3 = inlined_call_operand.hbm [shape: f32[128,256], index: 3, kind: input, shape index: {}]   ;;  %s414_s4 = inlined_call_operand.vmem [shape: f32[1,256], index: 4, kind: input, shape index: {}]   ;;  %s415_s5 = inlined_call_operand.hbm [shape: f32[2,256], index: 5, kind: output, shape index: {}]  }
   0x1   :  { %11 = vsyncpa [#allocation6], 0 }
   0x2   :  { %12 = vsyncpa [#allocation4], 0  ;;  %s322_s18 = smov [#allocation2]   ;;  %s323_s20 = smov [#allocation5]  }
   0x3   :  { %s19_s19 = sshll.u32 %s322_s18, 4  ;;  %s32_s21 = sshll.u32 %s323_s20, 4  ;;  %s20_s19 = int_to_ptr.vmem [resolvable:$true] %s19_s19  ;;  %s358_s21 = int_to_ptr.vmem [resolvable:$true] %s32_s21 }
   0x4   :  { %s250_s24 = scalar_lea.hbm %s410_s0, 32 }
   0x5   :  { %p251_p0 = scmp.ne.s32.totalorder %s410_s0, %s250_s24  ;;  %p254_p1 = scmp.lt.u32.totalorder %s250_s24, %s410_s0 }
   0x7   :  { %p256_p2 = pnand %p254_p1, %p251_p0 }
   0x9   :  { %259 = shalt.err (!%p256_p2)
}
   0xa   :  { %s260_s29 = scalar_lea.vmem %s20_s19, 32  ;;  %p265_p4 = scmp.lt.s32.totalorder %s20_s19, %s20_s19 }
   0xb   :  { %p261_p3 = scmp.ne.s32.totalorder %s20_s19, %s260_s29  ;;  %p266_p5 = scmp.lt.s32.totalorder %s260_s29, %s260_s29 }
   0xd   :  { %p267_p6 = por %p266_p5, %p265_p4 }
   0xf   :  { %p268_p7 = pnand %p267_p6, %p261_p3 }
  0x11   :  { %271 = shalt.err (!%p268_p7)
}
  0x12   :  { %22 = dma.hbm_to_vmem [thread:$0]  %s410_s0, 32, %s20_s19, [#allocation3]  }
  0x13   :  { %s272_s9 = scalar_lea.hbm %s413_s3, 4096 }
  0x14   :  { %p273_p8 = scmp.ne.s32.totalorder %s413_s3, %s272_s9  ;;  %p276_p9 = scmp.lt.u32.totalorder %s272_s9, %s413_s3 }
  0x16   :  { %p278_p10 = pnand %p276_p9, %p273_p8 }
  0x18   :  { %281 = shalt.err (!%p278_p10)
}
  0x19   :  { %s282_s14 = scalar_lea.vmem %s358_s21, 4096  ;;  %p287_p12 = scmp.lt.s32.totalorder %s358_s21, %s358_s21 }
  0x1a   :  { %p283_p11 = scmp.ne.s32.totalorder %s358_s21, %s282_s14  ;;  %p288_p13 = scmp.lt.s32.totalorder %s282_s14, %s282_s14 }
  0x1c   :  { %p289_p0 = por %p288_p13, %p287_p12 }
  0x1e   :  { %p290_p1 = pnand %p289_p0, %p283_p11 }
  0x20   :  { %293 = shalt.err (!%p290_p1)
}
  0x21   :  { %s324_s0 = smov 256   ;;  %s325_s15 = smov 16  }
  0x22   :  { %38 = dma.hbm_to_vmem [thread:$0]  %s413_s3, 4096, %s358_s21, [#allocation6], %s324_s0, %s324_s0, %s325_s15  }
  0x23   :  { %316 = dma.done.wait [#allocation3], 32  }
  0x24   :  { %317 = vsyncadd [#allocation3], 4294967264 }
  0x25   :  { %318 = dma.done.wait [#allocation6], 4096  }
  0x26   :  { %319 = vsyncadd [#allocation6], 4294963200  ;;  %v326_v0 = vmov 0.0   ;;  %v67_v1 = vld [vmem:[#allocation5 + $0x8] sm:$0xff]  ;;  %v69_v2 = vld [vmem:[#allocation5 + $0x18] sm:$0xff]  ;;  %v100_v56 = vlaneseq  ;;  %s327_s21 = smov [#allocation7]  }
  0x27   :  { %174 = vmatprep.mubr.f32.mxu0 %v326_v0  ;;  %v66_v3 = vld [vmem:[#allocation5] sm:$0xff]  ;;  %v212_v4 = vpack.c.bf16 %v69_v2, %v67_v1  ;;  %v68_v5 = vld [vmem:[#allocation5 + $0x10] sm:$0xff]  ;;  %v71_v6 = vld [vmem:[#allocation5 + $0x28] sm:$0xff]  ;;  %s199_s22 = sshll.u32 %s327_s21, 4  ;;  %s200_s22 = int_to_ptr.vmem [resolvable:$true] %s199_s22 }
  0x28   :  { %v73_v7 = vld [vmem:[#allocation5 + $0x38] sm:$0xff]  ;;  %v214_v8 = vpack.c.bf16 %v68_v5, %v66_v3  ;;  %v70_v10 = vld [vmem:[#allocation5 + $0x20] sm:$0xff]  ;;  %v72_v11 = vld [vmem:[#allocation5 + $0x30] sm:$0xff]  ;;  %v101_v57 = vshrl.u32 %v100_v56, 7  ;;  %s294_s23 = scalar_lea.vmem %s200_s22, 64  ;;  %p299_p3 = scmp.lt.s32.totalorder %s200_s22, %s200_s22 }
  0x29   :  { %v216_v9 = vpack.c.bf16 %v73_v7, %v71_v6  ;;  %v75_v12 = vld [vmem:[#allocation5 + $0x48] sm:$0xff]  ;;  %213 = vmatprep.subr.bf16.mxu0 %v212_v4  ;;  %v77_v13 = vld [vmem:[#allocation5 + $0x58] sm:$0xff]  ;;  %v218_v14 = vpack.c.bf16 %v72_v11, %v70_v10  ;;  %v74_v16 = vld [vmem:[#allocation5 + $0x40] sm:$0xff]  ;;  %p295_p2 = scmp.ne.s32.totalorder %s200_s22, %s294_s23  ;;  %p300_p4 = scmp.lt.s32.totalorder %s294_s23, %s294_s23 }
  0x2a   :  { %215 = vmatpush1.bf16.msra.mxu0 %v214_v8  ;;  %v220_v15 = vpack.c.bf16 %v77_v13, %v75_v12  ;;  %v76_v17 = vld [vmem:[#allocation5 + $0x50] sm:$0xff]  ;;  %v79_v18 = vld [vmem:[#allocation5 + $0x68] sm:$0xff]  ;;  %v81_v19 = vld [vmem:[#allocation5 + $0x78] sm:$0xff]  ;;  %v102_v58 = vsub.s32 0, %v101_v57  ;;  %v106_v60 = vsub.s32 1, %v101_v57 }
  0x2b   :  { %217 = vmatprep.subr.bf16.mxu0 %v216_v9  ;;  %v222_v20 = vpack.c.bf16 %v76_v17, %v74_v16  ;;  %v224_v21 = vpack.c.bf16 %v81_v19, %v79_v18  ;;  %v78_v22 = vld [vmem:[#allocation5 + $0x60] sm:$0xff]  ;;  %v80_v23 = vld [vmem:[#allocation5 + $0x70] sm:$0xff]  ;;  %v83_v24 = vld [vmem:[#allocation5 + $0x88] sm:$0xff]  ;;  %p301_p5 = por %p300_p4, %p299_p3 }
  0x2c   :  { %v85_v25 = vld [vmem:[#allocation5 + $0x98] sm:$0xff]  ;;  %v226_v26 = vpack.c.bf16 %v80_v23, %v78_v22  ;;  %v82_v28 = vld [vmem:[#allocation5 + $0x80] sm:$0xff]  ;;  %v84_v29 = vld [vmem:[#allocation5 + $0x90] sm:$0xff] }
  0x2d   :  { %v228_v27 = vpack.c.bf16 %v85_v25, %v83_v24  ;;  %v87_v30 = vld [vmem:[#allocation5 + $0xa8] sm:$0xff]  ;;  %v89_v31 = vld [vmem:[#allocation5 + $0xb8] sm:$0xff]  ;;  %v230_v32 = vpack.c.bf16 %v84_v29, %v82_v28  ;;  %v86_v36 = vld [vmem:[#allocation5 + $0xa0] sm:$0xff]  ;;  %p302_p6 = pnand %p301_p5, %p295_p2 }
  0x2e   :  { %219 = vmatpush1.bf16.msra.mxu0 %v218_v14  ;;  %v47_v33 = vld [vmem:[#allocation2] sm:$0x3]  ;;  %v232_v35 = vpack.c.bf16 %v89_v31, %v87_v30  ;;  %v88_v37 = vld [vmem:[#allocation5 + $0xb0] sm:$0xff]  ;;  %v91_v38 = vld [vmem:[#allocation5 + $0xc8] sm:$0xff] }
  0x2f   :  { %221 = vmatprep.subr.bf16.mxu0 %v220_v15  ;;  %v209_v34 = vld [vmem:[%s411_s1] ss:$0 sm:$0xff]  ;;  %v234_v41 = vpack.c.bf16 %v88_v37, %v86_v36  ;;  %v90_v44 = vld [vmem:[#allocation5 + $0xc0] sm:$0xff]  ;;  %v92_v45 = vld [vmem:[#allocation5 + $0xd0] sm:$0xff] }
  0x30   :  { %v93_v39 = vld [vmem:[#allocation5 + $0xd8] sm:$0xff]  ;;  %v55_v40 = vmul.f32 %v209_v34, %v47_v33  ;;  %v95_v46 = vld [vmem:[#allocation5 + $0xe8] sm:$0xff]  ;;  %v238_v49 = vpack.c.bf16 %v92_v45, %v90_v44  ;;  %v94_v51 = vld [vmem:[#allocation5 + $0xe0] sm:$0xff] }
  0x31   :  { %v210_v42 = vld [vmem:[%s412_s2] ss:$0 sm:$0xff]  ;;  %v236_v43 = vpack.c.bf16 %v93_v39, %v91_v38  ;;  %v96_v52 = vld [vmem:[#allocation5 + $0xf0] sm:$0xff] }
  0x32   :  { %223 = vmatpush1.bf16.msra.mxu0 %v222_v20  ;;  %v97_v47 = vld [vmem:[#allocation5 + $0xf8] sm:$0xff]  ;;  %v63_v48 = vadd.f32 %v210_v42, %v55_v40  ;;  %v242_v54 = vpack.c.bf16 %v96_v52, %v94_v51 }
  0x33   :  { %225 = vmatprep.subr.bf16.mxu0 %v224_v21  ;;  %v240_v50 = vpack.c.bf16 %v97_v47, %v95_v46  ;;  %v98_v59 = vld [vmem:[%s414_s4] sm:$0x3] }
  0x34   :  { %v64_v53 = vmul.f32 0.01, %v63_v48  ;;  %v103_v61 = vrot.slane %v98_v59, %v102_v58  ;;  %v107_v62 = vrot.slane %v98_v59, %v106_v60 }
  0x36   :  { %227 = vmatpush1.bf16.msra.mxu0 %v226_v26  ;;  %v65_v55 = vmax.f32 %v63_v48, %v64_v53 }
  0x37   :  { %229 = vmatprep.subr.bf16.mxu0 %v228_v27 }
  0x3a   :  { %231 = vmatpush1.bf16.msra.mxu0 %v230_v32 }
  0x3b   :  { %233 = vmatprep.subr.bf16.mxu0 %v232_v35 }
  0x3e   :  { %235 = vmatpush1.bf16.msra.mxu0 %v234_v41 }
  0x3f   :  { %237 = vmatprep.subr.bf16.mxu0 %v236_v43 }
  0x42   :  { %239 = vmatpush1.bf16.msra.mxu0 %v238_v49 }
  0x43   :  { %241 = vmatprep.subr.bf16.mxu0 %v240_v50 }
  0x46   :  { %243 = vmatpush1.bf16.msra.mxu0 %v242_v54 }
  0x49   :  { %175 = vmatmul.mubr.f32.vlgmr.msra.gmra.mrb[0].mxu0 %v65_v55 }
 0x11c   :  { %v176_v63 = vpop.f32.mrb[0].mxu0 }
 0x11d   :  { %v177_v0 = vadd.f32 %v176_v63, %v103_v61  ;;  %v178_v1 = vpop.f32.mrb[1].mxu0 }
 0x11e   :  { %v179_v2 = vadd.f32 %v178_v1, %v107_v62 }
 0x120   :  { %v183_v3 = vcombine.low %v177_v0, %v179_v2 }
 0x122   :  { %211 = vst.sshfl [vmem:[#allocation7] sm:$0x33 pattern:$0x76325410] %v183_v3 }
 0x123   :  { %305 = shalt.err (!%p302_p6)
}
 0x124   :  { %s306_s25 = scalar_lea.hbm %s415_s5, 64 }
 0x125   :  { %p307_p7 = scmp.ne.s32.totalorder %s415_s5, %s306_s25  ;;  %p310_p8 = scmp.lt.u32.totalorder %s306_s25, %s415_s5 }
 0x127   :  { %p312_p9 = pnand %p310_p8, %p307_p7 }
 0x129   :  { %315 = shalt.err (!%p312_p9)
}
 0x12a   :  { %202 = dma.vmem_to_hbm [thread:$0]  %s200_s22, 64, %s415_s5, [#allocation4]  }
 0x12b   :  { %320 = dma.done.wait [#allocation4], 64  }
 0x12c   :  { %321 = vsyncadd [#allocation4], 4294967232 }
 0x12d   :  { %206 = vsyncpa [#allocation3], 1 }
 0x12e   :  { %207 = vsyncpa [#allocation6], 1 }
 0x12f   :  { %208 = vsyncpa [#allocation4], 1 }

</bundles_post_ra>
